<compile_context>
chip_gen: v7x
topology: tpu7x:2x2x1
jax: 0.10.0
libtpu: 0.0.40
codegen_flags: <defaults>
</compile_context>

<pallas_src>
import jax
import jax.numpy as jnp
from jax.experimental import pallas as pl
from jax.experimental.pallas import tpu as pltpu

ALPHA = 0.8
GAMMA = 2

LANE = 128             # lane width
MAX_BLOCK_ROWS = 2048  # (2048, 128) f32 = 1 MiB per input buffer
MAX_SPLITS = 2         # leading "parallel" axis (2 TensorCores on v7x)
PAD_LOGIT = -1e30      # padded logit with target 0 -> exactly 0 BCE


def _bce_partial_kernel(x_ref, t_ref, out_ref, acc_ref):
    """Accumulates one split's BCE sum; emits it on the last inner step."""
    i = pl.program_id(1)

    @pl.when(i == 0)
    def _():
        acc_ref[...] = jnp.zeros_like(acc_ref)

    x = x_ref[...].astype(jnp.float32)
    t = t_ref[...].astype(jnp.float32)

    # Numerically-stable BCE-with-logits, matching sigmoid + BCE with
    # PyTorch's -100 clamp on the log terms (2 EUP ops/elem: exp + log).
    #   log(sigmoid(x))     = min(x, 0)  - log(1 + exp(-|x|))
    #   log(1 - sigmoid(x)) = min(-x, 0) - log(1 + exp(-|x|))
    softplus = jnp.log(1.0 + jnp.exp(-jnp.abs(x)))
    log_p = jnp.maximum(jnp.minimum(x, 0.0) - softplus, -100.0)
    log_1mp = jnp.maximum(jnp.minimum(-x, 0.0) - softplus, -100.0)
    bce = -(t * log_p + (1.0 - t) * log_1mp)

    # Steady state: element-wise accumulate (VALU only, no cross-lane work).
    acc_ref[...] += bce

    @pl.when(i == pl.num_programs(1) - 1)
    def _():
        total = jnp.sum(acc_ref[...])               # one XLU reduce per split
        out_ref[...] = jnp.full(out_ref.shape, total, dtype=jnp.float32)


def focal_loss(inputs, targets, alpha=ALPHA, gamma=GAMMA, smooth=1):
    # TODO(synk): `smooth` is unused, matching the reference PyTorch module.
    x = inputs.reshape(-1)
    t = targets.reshape(-1)
    if not jnp.issubdtype(x.dtype, jnp.floating) or x.dtype.itemsize > 4:
        x = x.astype(jnp.float32)
    if not jnp.issubdtype(t.dtype, jnp.floating) or t.dtype.itemsize > 4:
        t = t.astype(jnp.float32)

    n = x.shape[0]

    # Block rows: as large as possible (up to MAX_BLOCK_ROWS), rounded to the
    # sublane-packing multiple of the narrowest streamed dtype.
    pack = max(4 // x.dtype.itemsize, 4 // t.dtype.itemsize, 1)
    row_mult = 8 * pack
    rows_needed = pl.cdiv(n, LANE)
    block_rows = min(MAX_BLOCK_ROWS, pl.cdiv(rows_needed, row_mult) * row_mult)
    block_elems = block_rows * LANE

    # Split across TensorCores only when there is more than one tile of work,
    # so tiny inputs don't pay for a fully-padded extra tile + grid step.
    num_splits = MAX_SPLITS if n > block_elems else 1

    tiles_per_split = pl.cdiv(n, block_elems * num_splits)
    n_pad = num_splits * tiles_per_split * block_elems

    if n_pad != n:
        # Padded logits of -1e30 with target 0 contribute exactly 0 BCE, so
        # no in-kernel masking is needed. (Skipped when already aligned.)
        x = jnp.pad(x, (0, n_pad - n), constant_values=PAD_LOGIT)
        t = jnp.pad(t, (0, n_pad - n))

    rows = n_pad // LANE
    x2 = x.reshape(rows, LANE)
    t2 = t.reshape(rows, LANE)

    def tile_map(j, i):
        return (j * tiles_per_split + i, 0)

    partials = pl.pallas_call(
        _bce_partial_kernel,
        out_shape=jax.ShapeDtypeStruct((num_splits * 8, LANE), jnp.float32),
        grid_spec=pltpu.PrefetchScalarGridSpec(
            num_scalar_prefetch=0,
            grid=(num_splits, tiles_per_split),
            in_specs=[
                pl.BlockSpec((block_rows, LANE), tile_map),
                pl.BlockSpec((block_rows, LANE), tile_map),
            ],
            out_specs=pl.BlockSpec((8, LANE), lambda j, i: (j, 0)),
            scratch_shapes=[pltpu.VMEM((block_rows, LANE), jnp.float32)],
        ),
        compiler_params=pltpu.CompilerParams(
            # Outer split axis is independent (megacore / v7x 2 TCs); inner
            # axis is the running reduction over row tiles.
            dimension_semantics=("parallel", "arbitrary"),
        ),
    )(x2, t2)

    # Combine per-split partial sums + the scalar focal transform (a handful
    # of scalar ops; left to XLA).
    split_sums = partials[::8, 0]
    bce_mean = jnp.sum(split_sums) / jnp.float32(n)
    one_minus = 1.0 - jnp.exp(-bce_mean)

    g = float(gamma)
    if g == int(g) and 0 <= int(g) <= 8:
        pw = jnp.float32(1.0)
        for _ in range(int(g)):          # integer gamma -> plain multiplies
            pw = pw * one_minus
    else:
        pw = one_minus ** gamma
    return alpha * pw * bce_mean


if __name__ == "__main__":
    key = jax.random.PRNGKey(0)
    k1, k2 = jax.random.split(key)

    # Shapes consistent with a segmentation-style FocalLoss usage (NCHW logits).
    x = jax.random.normal(k1, (2, 4, 16, 16), dtype=jnp.float32)
    targets = (jax.random.uniform(k2, (2, 4, 16, 16)) > 0.5).astype(jnp.float32)

    loss = focal_loss(x, targets)
    jax.block_until_ready(loss)

    # Pure-JAX reference check (same math as the PyTorch module, no Pallas).
    p = jax.nn.sigmoid(x).reshape(-1)
    t = targets.reshape(-1)
    bce = jnp.mean(-(t * jnp.log(p) + (1.0 - t) * jnp.log(1.0 - p)))
    ref = ALPHA * (1.0 - jnp.exp(-bce)) ** GAMMA * bce
    assert jnp.allclose(loss, ref, rtol=1e-5, atol=1e-6), (loss, ref)

    print("KERNEL_OK")
</pallas_src>

<mosaic_0001>
module attributes {stable_mosaic.version = 11 : i64} {
  func.func @_bce_partial_kernel(%arg0: i32, %arg1: i32, %arg2: memref<16x128xf32, #tpu.memory_space<vmem>>, %arg3: memref<16x128xf32, #tpu.memory_space<vmem>>, %arg4: memref<8x128xf32, #tpu.memory_space<vmem>>, %arg5: memref<16x128xf32, #tpu.memory_space<vmem>>) attributes {dimension_semantics = [#tpu.dimension_semantics<parallel>, #tpu.dimension_semantics<arbitrary>], iteration_bounds = array<i64: 1, 1>, scalar_prefetch = 0 : i64, scratch_operands = 1 : i64, tpu.core_type = #tpu.core_type<tc>, window_params = [{transform_indices = @transform_0, window_bounds = array<i64: 16, 128>}, {transform_indices = @transform_1, window_bounds = array<i64: 16, 128>}, {transform_indices = @transform_2, window_bounds = array<i64: 8, 128>}]} {
    %c0_i32 = arith.constant 0 : i32
    %0 = arith.cmpi eq, %arg1, %c0_i32 : i32
    %1 = arith.extui %0 : i1 to i32
    %c0_i32_0 = arith.constant 0 : i32
    %2 = arith.cmpi ne, %1, %c0_i32_0 : i32
    scf.if %2 {
      %cst_18 = arith.constant 0.000000e+00 : f32
      %37 = vector.broadcast %cst_18 : f32 to vector<16x128xf32>
      %c0_19 = arith.constant 0 : index
      %c0_20 = arith.constant 0 : index
      %38 = vector.load %arg5[%c0_19, %c0_20] : memref<16x128xf32, #tpu.memory_space<vmem>>, vector<16x128xf32>
      tpu.vector_store %arg5[%c0_19, %c0_20], %37 {strides = array<i32>} : memref<16x128xf32, #tpu.memory_space<vmem>>, vector<16x128xf32>,
    } else {
    }
    %c0 = arith.constant 0 : index
    %c0_1 = arith.constant 0 : index
    %3 = vector.load %arg2[%c0, %c0_1] : memref<16x128xf32, #tpu.memory_space<vmem>>, vector<16x128xf32>
    %c0_2 = arith.constant 0 : index
    %c0_3 = arith.constant 0 : index
    %4 = vector.load %arg3[%c0_2, %c0_3] : memref<16x128xf32, #tpu.memory_space<vmem>>, vector<16x128xf32>
    %5 = math.absf %3 : vector<16x128xf32>
    %cst = arith.constant 0.000000e+00 : f32
    %6 = vector.broadcast %cst : f32 to vector<16x128xf32>
    %7 = arith.subf %6, %5 : vector<16x128xf32>
    %8 = math.exp %7 : vector<16x128xf32>
    %cst_4 = arith.constant 1.000000e+00 : f32
    %9 = vector.broadcast %cst_4 : f32 to vector<16x128xf32>
    %10 = arith.addf %9, %8 : vector<16x128xf32>
    %11 = math.log %10 : vector<16x128xf32>
    %cst_5 = arith.constant 0.000000e+00 : f32
    %12 = vector.broadcast %cst_5 : f32 to vector<16x128xf32>
    %13 = arith.minimumf %3, %12 : vector<16x128xf32>
    %14 = arith.subf %13, %11 : vector<16x128xf32>
    %cst_6 = arith.constant -1.000000e+02 : f32
    %15 = vector.broadcast %cst_6 : f32 to vector<16x128xf32>
    %16 = arith.maximumf %14, %15 : vector<16x128xf32>
    %cst_7 = arith.constant 0.000000e+00 : f32
    %17 = vector.broadcast %cst_7 : f32 to vector<16x128xf32>
    %18 = arith.subf %17, %3 : vector<16x128xf32>
    %cst_8 = arith.constant 0.000000e+00 : f32
    %19 = vector.broadcast %cst_8 : f32 to vector<16x128xf32>
    %20 = arith.minimumf %18, %19 : vector<16x128xf32>
    %21 = arith.subf %20, %11 : vector<16x128xf32>
    %cst_9 = arith.constant -1.000000e+02 : f32
    %22 = vector.broadcast %cst_9 : f32 to vector<16x128xf32>
    %23 = arith.maximumf %21, %22 : vector<16x128xf32>
    %24 = arith.mulf %4, %16 : vector<16x128xf32>
    %cst_10 = arith.constant 1.000000e+00 : f32
    %25 = vector.broadcast %cst_10 : f32 to vector<16x128xf32>
    %26 = arith.subf %25, %4 : vector<16x128xf32>
    %27 = arith.mulf %26, %23 : vector<16x128xf32>
    %28 = arith.addf %24, %27 : vector<16x128xf32>
    %cst_11 = arith.constant 0.000000e+00 : f32
    %29 = vector.broadcast %cst_11 : f32 to vector<16x128xf32>
    %30 = arith.subf %29, %28 : vector<16x128xf32>
    %c0_12 = arith.constant 0 : index
    %c0_13 = arith.constant 0 : index
    %31 = vector.load %arg5[%c0_12, %c0_13] : memref<16x128xf32, #tpu.memory_space<vmem>>, vector<16x128xf32>
    %32 = arith.addf %31, %30 : vector<16x128xf32>
    %c0_14 = arith.constant 0 : index
    %c0_15 = arith.constant 0 : index
    %33 = vector.load %arg5[%c0_14, %c0_15] : memref<16x128xf32, #tpu.memory_space<vmem>>, vector<16x128xf32>
    tpu.vector_store %arg5[%c0_14, %c0_15], %32 {strides = array<i32>} : memref<16x128xf32, #tpu.memory_space<vmem>>, vector<16x128xf32>,
    %c0_i32_16 = arith.constant 0 : i32
    %34 = arith.cmpi eq, %arg1, %c0_i32_16 : i32
    %35 = arith.extui %34 : i1 to i32
    %c0_i32_17 = arith.constant 0 : i32
    %36 = arith.cmpi ne, %35, %c0_i32_17 : i32
    scf.if %36 {
      %c0_18 = arith.constant 0 : index
      %c0_19 = arith.constant 0 : index
      %37 = vector.load %arg5[%c0_18, %c0_19] : memref<16x128xf32, #tpu.memory_space<vmem>>, vector<16x128xf32>
      %38 = vector.shape_cast %37 : vector<16x128xf32> to vector<1x16x128xf32>
      %cst_20 = arith.constant dense<0.000000e+00> : vector<1xf32>
      %39 = vector.multi_reduction <add>, %38, %cst_20 [1, 2] : vector<1x16x128xf32> to vector<1xf32>
      %40 = vector.shape_cast %39 : vector<1xf32> to vector<1x1x1xf32>
      %41 = vector.extract %40[0, 0, 0] : f32 from vector<1x1x1xf32>
      %42 = vector.broadcast %41 : f32 to vector<8x128xf32>
      %c0_21 = arith.constant 0 : index
      %c0_22 = arith.constant 0 : index
      %43 = vector.load %arg4[%c0_21, %c0_22] : memref<8x128xf32, #tpu.memory_space<vmem>>, vector<8x128xf32>
      tpu.vector_store %arg4[%c0_21, %c0_22], %42 {strides = array<i32>} : memref<8x128xf32, #tpu.memory_space<vmem>>, vector<8x128xf32>,
    } else {
    }
    return
  }
  func.func @transform_0(%arg0: i32, %arg1: i32) -> (i32, i32) {
    %c1_i32 = arith.constant 1 : i32
    %0 = arith.muli %arg0, %c1_i32 : i32
    %1 = arith.addi %0, %arg1 : i32
    %c0_i32 = arith.constant 0 : i32
    %c0_i32_0 = arith.constant 0 : i32
    return %1, %c0_i32 : i32, i32
  }
  func.func @transform_1(%arg0: i32, %arg1: i32) -> (i32, i32) {
    %c1_i32 = arith.constant 1 : i32
    %0 = arith.muli %arg0, %c1_i32 : i32
    %1 = arith.addi %0, %arg1 : i32
    %c0_i32 = arith.constant 0 : i32
    %c0_i32_0 = arith.constant 0 : i32
    return %1, %c0_i32 : i32, i32
  }
  func.func @transform_2(%arg0: i32, %arg1: i32) -> (i32, i32) {
    %c0_i32 = arith.constant 0 : i32
    %c0_i32_0 = arith.constant 0 : i32
    return %arg0, %c0_i32 : i32, i32
  }
}

</mosaic_0001>

<bundles_post_ra>
// kernel: tpu_custom_call.1
= control target key start
LH: loop header
LB: loop body
LE: loop exit
PB: predicated region body
PF: predicated region fallthrough
CT: control target
= control target key end

     0   :  { %7 = vsyncpa [#allocation4], 0  ;;  %s282_s0 = inlined_call_operand.hbm [shape: f32[16,128], index: 0, kind: input, shape index: {}]   ;;  %s283_s1 = inlined_call_operand.hbm [shape: f32[16,128], index: 1, kind: input, shape index: {}]   ;;  %s284_s2 = inlined_call_operand.hbm [shape: f32[8,128], index: 2, kind: output, shape index: {}]  }
   0x1   :  { %8 = vsyncpa [#allocation7], 0 }
   0x2   :  { %9 = vsyncpa [#allocation5], 0  ;;  %s226_s9 = smov [#allocation3]   ;;  %s154_s13 = scalar_lea.hbm %s282_s0, 256 }
   0x3   :  { %s19_s10 = sshll.u32 %s226_s9, 4  ;;  %p155_p0 = scmp.ne.s32.totalorder %s282_s0, %s154_s13  ;;  %s20_s10 = int_to_ptr.vmem [resolvable:$true] %s19_s10 }
   0x4   :  { %p158_p1 = scmp.lt.u32.totalorder %s154_s13, %s282_s0 }
   0x6   :  { %p160_p2 = pnand %p158_p1, %p155_p0 }
   0x8   :  { %163 = shalt.err (!%p160_p2)
}
   0x9   :  { %s164_s18 = scalar_lea.vmem %s20_s10, 256  ;;  %p169_p4 = scmp.lt.s32.totalorder %s20_s10, %s20_s10 }
   0xa   :  { %p165_p3 = scmp.ne.s32.totalorder %s20_s10, %s164_s18  ;;  %p170_p5 = scmp.lt.s32.totalorder %s164_s18, %s164_s18 }
   0xc   :  { %p171_p6 = por %p170_p5, %p169_p4 }
   0xe   :  { %p172_p7 = pnand %p171_p6, %p165_p3 }
  0x10   :  { %175 = shalt.err (!%p172_p7)
}
  0x11   :  { %s227_s19 = smov 128   ;;  %s228_s20 = smov 8  }
  0x12   :  { %25 = dma.hbm_to_vmem [thread:$0]  %s282_s0, 256, %s20_s10, [#allocation4], %s227_s19, %s227_s19, %s228_s20  }
  0x13   :  { %s229_s23 = smov [#allocation6]   ;;  %s176_s27 = scalar_lea.hbm %s283_s1, 256 }
  0x14   :  { %s35_s24 = sshll.u32 %s229_s23, 4  ;;  %p177_p8 = scmp.ne.s32.totalorder %s283_s1, %s176_s27  ;;  %s36_s24 = int_to_ptr.vmem [resolvable:$true] %s35_s24 }
  0x15   :  { %p180_p9 = scmp.lt.u32.totalorder %s176_s27, %s283_s1 }
  0x17   :  { %p182_p10 = pnand %p180_p9, %p177_p8 }
  0x19   :  { %185 = shalt.err (!%p182_p10)
}
  0x1a   :  { %s186_s4 = scalar_lea.vmem %s36_s24, 256  ;;  %p191_p12 = scmp.lt.s32.totalorder %s36_s24, %s36_s24 }
  0x1b   :  { %p187_p11 = scmp.ne.s32.totalorder %s36_s24, %s186_s4  ;;  %p192_p13 = scmp.lt.s32.totalorder %s186_s4, %s186_s4 }
  0x1d   :  { %p193_p0 = por %p192_p13, %p191_p12 }
  0x1f   :  { %p194_p1 = pnand %p193_p0, %p187_p11 }
  0x21   :  { %197 = shalt.err (!%p194_p1)
}
  0x22   :  { %41 = dma.hbm_to_vmem [thread:$0]  %s283_s1, 256, %s36_s24, [#allocation7], %s227_s19, %s227_s19, %s228_s20  }
  0x23   :  { %220 = dma.done.wait [#allocation4], 256  }
  0x24   :  { %221 = vsyncadd [#allocation4], 4294967040 }
  0x25   :  { %222 = dma.done.wait [#allocation7], 256  }
  0x26   :  { %223 = vsyncadd [#allocation7], 4294967040  ;;  %v58_v0 = vld [vmem:[#allocation3] sm:$0xff]  ;;  %v59_v1 = vld [vmem:[#allocation3 + $0x8] sm:$0xff]  ;;  %s230_s1 = smov [#allocation8]  }
  0x27   :  { %v62_v2 = vand.u32 2147483647, %v58_v0  ;;  %v63_v3 = vand.u32 2147483647, %v59_v1  ;;  %v82_v12 = vsub.f32 0.0, %v58_v0  ;;  %v83_v13 = vsub.f32 0.0, %v59_v1 }
  0x28   :  { %v76_v14 = vmin.f32 %v58_v0, 0.0  ;;  %v60_v17 = vld [vmem:[#allocation6] sm:$0xff]  ;;  %v77_v18 = vmin.f32 %v59_v1, 0.0  ;;  %v61_v21 = vld [vmem:[#allocation6 + $0x8] sm:$0xff]  ;;  %s129_s6 = sshll.u32 %s230_s1, 4  ;;  %s130_s6 = int_to_ptr.vmem [resolvable:$true] %s129_s6 }
  0x29   :  { %v64_v4 = vsub.f32 0.0, %v62_v2  ;;  %v65_v5 = vsub.f32 0.0, %v63_v3  ;;  %v84_v15 = vmin.f32 %v82_v12, 0.0  ;;  %v85_v19 = vmin.f32 %v83_v13, 0.0  ;;  %s198_s8 = scalar_lea.vmem %s130_s6, 128  ;;  %p203_p3 = scmp.lt.s32.totalorder %s130_s6, %s130_s6 }
  0x2a   :  { %v92_v26 = vsub.f32 1.0, %v60_v17  ;;  %v93_v29 = vsub.f32 1.0, %v61_v21  ;;  %p199_p2 = scmp.ne.s32.totalorder %s130_s6, %s198_s8  ;;  %p204_p4 = scmp.lt.s32.totalorder %s198_s8, %s198_s8 }
  0x2b   :  { %v66_v6 = vmul.f32 1.442695, %v64_v4  ;;  %v68_v7 = vmul.f32 1.442695, %v65_v5 }
  0x2c   :  { %p205_p5 = por %p204_p4, %p203_p3 }
  0x2d   :  { %146 = vpow2.f32 %v66_v6 }
  0x2e   :  { %148 = vpow2.f32 %v68_v7  ;;  %p206_p6 = pnand %p205_p5, %p199_p2 }
  0x37   :  { %v147_v8 = vpop.eup %146 }
  0x38   :  { %v149_v9 = vpop.eup %148  ;;  %v70_v10 = vadd.f32 1.0, %v147_v8 }
  0x39   :  { %v71_v11 = vadd.f32 1.0, %v149_v9 }
  0x3a   :  { %150 = vlog2.f32 %v70_v10 }
  0x3b   :  { %152 = vlog2.f32 %v71_v11 }
  0x44   :  { %v151_v16 = vpop.eup %150 }
  0x45   :  { %v153_v20 = vpop.eup %152  ;;  %v73_v22 = vmul.f32 0.6931472, %v151_v16 }
  0x46   :  { %v75_v23 = vmul.f32 0.6931472, %v153_v20 }
  0x47   :  { %v78_v24 = vsub.f32 %v76_v14, %v73_v22  ;;  %v86_v25 = vsub.f32 %v84_v15, %v73_v22 }
  0x48   :  { %v79_v27 = vsub.f32 %v77_v18, %v75_v23  ;;  %v87_v28 = vsub.f32 %v85_v19, %v75_v23 }
  0x49   :  { %v80_v30 = vmax.f32 %v78_v24, -100.0  ;;  %v88_v31 = vmax.f32 %v86_v25, -100.0 }
  0x4a   :  { %v81_v32 = vmax.f32 %v79_v27, -100.0  ;;  %v89_v33 = vmax.f32 %v87_v28, -100.0 }
  0x4b   :  { %v90_v34 = vmul.f32 %v80_v30, %v60_v17  ;;  %v94_v35 = vmul.f32 %v92_v26, %v88_v31 }
  0x4c   :  { %v91_v36 = vmul.f32 %v81_v32, %v61_v21  ;;  %v95_v37 = vmul.f32 %v93_v29, %v89_v33 }
  0x4d   :  { %v96_v38 = vadd.f32 %v94_v35, %v90_v34 }
  0x4e   :  { %v97_v39 = vadd.f32 %v95_v37, %v91_v36 }
  0x4f   :  { %v98_v40 = vsub.f32 0.0, %v96_v38 }
  0x50   :  { %v99_v41 = vsub.f32 0.0, %v97_v39 }
  0x52   :  { %v111_v42 = vadd.f32 %v99_v41, %v98_v40 }
  0x54   :  { %112 = vadd.xlane.f32.xlu0 %v111_v42 }
  0xe1   :  { %v113_v43 = vpop.xlane.xlu0 %112 }
  0xe2   :  { %v114_v44 = vrot.slane %v113_v43, 4 }
  0xe4   :  { %v115_v45 = vadd.f32 %v114_v44, %v113_v43 }
  0xe6   :  { %v116_v46 = vrot.slane %v115_v45, 2 }
  0xe8   :  { %v117_v47 = vadd.f32 %v116_v46, %v115_v45 }
  0xea   :  { %v118_v48 = vrot.slane %v117_v47, 1 }
  0xec   :  { %v119_v49 = vadd.f32 %v118_v48, %v117_v47 }
  0xee   :  { %139 = vpush %v119_v49 }
 0x11f   :  { %s140_s7 = spop %139 }
 0x120   :  { %v121_v50 = vstv %s140_s7 }
 0x121   :  { %122 = vst [vmem:[#allocation8] sm:$0xff] %v121_v50 }
 0x122   :  { %209 = shalt.err (!%p206_p6)
}
 0x123   :  { %s210_s11 = scalar_lea.hbm %s284_s2, 128 }
 0x124   :  { %p211_p7 = scmp.ne.s32.totalorder %s284_s2, %s210_s11  ;;  %p214_p8 = scmp.lt.u32.totalorder %s210_s11, %s284_s2 }
 0x126   :  { %p216_p9 = pnand %p214_p8, %p211_p7 }
 0x128   :  { %219 = shalt.err (!%p216_p9)
}
 0x129   :  { %132 = dma.vmem_to_hbm [thread:$0]  %s130_s6, 128, %s284_s2, [#allocation5]  }
 0x12a   :  { %224 = dma.done.wait [#allocation5], 128  }
 0x12b   :  { %225 = vsyncadd [#allocation5], 4294967168 }
 0x12c   :  { %136 = vsyncpa [#allocation4], 1 }
 0x12d   :  { %137 = vsyncpa [#allocation7], 1 }
 0x12e   :  { %138 = vsyncpa [#allocation5], 1 }

</bundles_post_ra>
